<compile_context>
chip_gen: v6e
topology: v6e:2x2x1
jax: 0.10.0
libtpu: 0.0.40
codegen_flags: <defaults>
</compile_context>

<pallas_src>
import functools

import jax
import jax.numpy as jnp
from jax.experimental import pallas as pl
from jax.experimental.pallas import tpu as pltpu

_LANES = 128
_NEG_BIG = -1e30  # softmax padding value: exp(_NEG_BIG - max) == 0 in f32


def _policy_predictor_kernel(hard: bool, in_ref, out_ref):
    # Row 0: selection logits (padded with -1e30 beyond n_sub_policy).
    # Row 1: magnitude weights, flattened (padded with 0 beyond n*d).
    sel = in_ref[0:1, :]                                  # (1, L) f32
    m = jnp.max(sel, axis=-1, keepdims=True)
    e = jnp.exp(sel - m)                                  # padded lanes -> 0
    denom = jnp.sum(e, axis=-1, keepdims=True)
    out_ref[0:1, :] = e * pl.reciprocal(denom, approx=False)

    w = in_ref[1:2, :]                                    # (1, L) f32
    if hard:
        out_ref[1:2, :] = jax.nn.sigmoid(w)
    else:
        out_ref[1:2, :] = jnp.clip(w + 0.5, 0.0, 1.0)


def policy_predictor_forward(policy_selection_weights, policy_mag_weights, name="default"):
    """Pallas equivalent of PolicyPredictor.forward().

    Args:
      policy_selection_weights: f32[n_sub_policy]
      policy_mag_weights:       f32[n_sub_policy, sub_policy_dim]
      name: 'Hard' selects the sigmoid branch, anything else the clamp branch.

    Returns:
      (probs f32[n_sub_policy], mags f32[n_sub_policy, sub_policy_dim])
    """
    n, d = policy_mag_weights.shape
    flat = n * d
    # Lane-dense slab width: multiple of 128, wide enough for both rows
    # (d >= 1 so n*d >= n and one width covers both).
    L = _LANES * (-(-flat // _LANES))

    sel = policy_selection_weights.astype(jnp.float32)
    mag = policy_mag_weights.astype(jnp.float32).reshape(-1)

    # Pack both parameters into one (2, L) lane-dense slab -> single input DMA.
    sel_row = jnp.full((L,), _NEG_BIG, dtype=jnp.float32).at[:n].set(sel)
    mag_row = jnp.zeros((L,), dtype=jnp.float32).at[:flat].set(mag)
    slab = jnp.stack([sel_row, mag_row], axis=0)          # (2, L)

    kernel = functools.partial(_policy_predictor_kernel, name == "Hard")

    out = pl.pallas_call(
        kernel,
        out_shape=jax.ShapeDtypeStruct((2, L), jnp.float32),
        in_specs=[pl.BlockSpec(memory_space=pltpu.MemorySpace.VMEM)],
        out_specs=pl.BlockSpec(memory_space=pltpu.MemorySpace.VMEM),
    )(slab)

    probs = out[0, :n]
    mags = out[1, :flat].reshape(n, d)
    return probs, mags


if __name__ == "__main__":
    n_sub_policy = 8
    sub_policy_dim = 16

    key = jax.random.PRNGKey(0)
    k_sel, k_mag = jax.random.split(key)
    # The module inits to zeros; use random values so both branches of the math
    # are exercised non-trivially.
    policy_selection_weights = jax.random.normal(k_sel, (n_sub_policy,), dtype=jnp.float32)
    policy_mag_weights = jax.random.normal(
        k_mag, (n_sub_policy, sub_policy_dim), dtype=jnp.float32
    )

    # default branch: clamp(0.5 + w, 0, 1)
    probs, mags = policy_predictor_forward(
        policy_selection_weights, policy_mag_weights, name="default"
    )
    jax.block_until_ready((probs, mags))

    # 'Hard' branch: sigmoid(w)
    probs_h, mags_h = policy_predictor_forward(
        policy_selection_weights, policy_mag_weights, name="Hard"
    )
    jax.block_until_ready((probs_h, mags_h))

    # Reference check in plain JAX.
    ref_probs = jax.nn.softmax(policy_selection_weights, axis=0)
    ref_mags_default = jnp.clip(0.5 + policy_mag_weights, 0.0, 1.0)
    ref_mags_hard = jax.nn.sigmoid(policy_mag_weights)

    assert probs.shape == (n_sub_policy,)
    assert mags.shape == (n_sub_policy, sub_policy_dim)
    assert jnp.allclose(probs, ref_probs, atol=1e-5), "probs mismatch"
    assert jnp.allclose(mags, ref_mags_default, atol=1e-6), "mags (default) mismatch"
    assert jnp.allclose(probs_h, ref_probs, atol=1e-5), "probs (Hard) mismatch"
    assert jnp.allclose(mags_h, ref_mags_hard, atol=1e-5), "mags (Hard) mismatch"

    print("KERNEL_OK")
</pallas_src>

<mosaic_0001>
module attributes {stable_mosaic.version = 11 : i64} {
  func.func @_policy_predictor_kernel(%arg0: memref<2x128xf32, #tpu.memory_space<vmem>>, %arg1: memref<2x128xf32, #tpu.memory_space<vmem>>) attributes {dimension_semantics = [], scalar_prefetch = 0 : i64, scratch_operands = 0 : i64, tpu.core_type = #tpu.core_type<tc>} {
    %c0 = arith.constant 0 : index
    %c0_0 = arith.constant 0 : index
    %0 = vector.load %arg0[%c0, %c0_0] : memref<2x128xf32, #tpu.memory_space<vmem>>, vector<1x128xf32>
    %cst = arith.constant dense<0xFF800000> : vector<1xf32>
    %1 = vector.multi_reduction <maximumf>, %0, %cst [1] : vector<1x128xf32> to vector<1xf32>
    %2 = vector.shape_cast %1 : vector<1xf32> to vector<1x1xf32>
    %3 = vector.broadcast %2 : vector<1x1xf32> to vector<1x128xf32>
    %4 = arith.subf %0, %3 : vector<1x128xf32>
    %5 = math.exp %4 : vector<1x128xf32>
    %cst_1 = arith.constant dense<0.000000e+00> : vector<1xf32>
    %6 = vector.multi_reduction <add>, %5, %cst_1 [1] : vector<1x128xf32> to vector<1xf32>
    %7 = vector.shape_cast %6 : vector<1xf32> to vector<1x1xf32>
    %8 = tpu.reciprocal %7 : vector<1x1xf32> -> vector<1x1xf32>
    %9 = vector.broadcast %8 : vector<1x1xf32> to vector<1x128xf32>
    %10 = arith.mulf %5, %9 : vector<1x128xf32>
    %c0_2 = arith.constant 0 : index
    %c0_3 = arith.constant 0 : index
    %11 = vector.load %arg1[%c0_2, %c0_3] : memref<2x128xf32, #tpu.memory_space<vmem>>, vector<1x128xf32>
    tpu.vector_store %arg1[%c0_2, %c0_3], %10 {strides = array<i32>} : memref<2x128xf32, #tpu.memory_space<vmem>>, vector<1x128xf32>,
    %c1 = arith.constant 1 : index
    %c0_4 = arith.constant 0 : index
    %12 = vector.load %arg0[%c1, %c0_4] : memref<2x128xf32, #tpu.memory_space<vmem>>, vector<1x128xf32>
    %cst_5 = arith.constant 5.000000e-01 : f32
    %13 = vector.broadcast %cst_5 : f32 to vector<1x128xf32>
    %14 = arith.addf %12, %13 : vector<1x128xf32>
    %cst_6 = arith.constant 0.000000e+00 : f32
    %cst_7 = arith.constant 1.000000e+00 : f32
    %15 = vector.broadcast %cst_6 : f32 to vector<1x128xf32>
    %16 = arith.maximumf %15, %14 : vector<1x128xf32>
    %17 = vector.broadcast %cst_7 : f32 to vector<1x128xf32>
    %18 = arith.minimumf %17, %16 : vector<1x128xf32>
    %c1_8 = arith.constant 1 : index
    %c0_9 = arith.constant 0 : index
    %19 = vector.load %arg1[%c1_8, %c0_9] : memref<2x128xf32, #tpu.memory_space<vmem>>, vector<1x128xf32>
    tpu.vector_store %arg1[%c1_8, %c0_9], %18 {strides = array<i32>} : memref<2x128xf32, #tpu.memory_space<vmem>>, vector<1x128xf32>,
    return
  }
}

</mosaic_0001>

<bundles_post_ra>
// kernel: tpu_custom_call.1
= control target key start
LH: loop header
LB: loop body
LE: loop exit
PB: predicated region body
PF: predicated region fallthrough
CT: control target
= control target key end

     0   :  { %6 = vsyncpa [#allocation3], 0  ;;  %s123_s0 = inlined_call_operand.hbm [shape: f32[2,128], index: 0, kind: input, shape index: {}]   ;;  %s124_s1 = inlined_call_operand.hbm [shape: f32[2,128], index: 1, kind: output, shape index: {}]  }
   0x1   :  { %7 = vsyncpa [#allocation4], 0  ;;  %s105_s6 = smov [#allocation2]  }
   0x2   :  { %s14_s7 = sshll.u32 %s105_s6, 4  ;;  %s15_s7 = int_to_ptr.vmem [resolvable:$true] %s14_s7 }
   0x3   :  { %s69_s8 = scalar_lea.vmem %s15_s7, 32  ;;  %p74_p1 = scmp.lt.s32.totalorder %s15_s7, %s15_s7 }
   0x4   :  { %p70_p0 = scmp.ne.s32.totalorder %s15_s7, %s69_s8  ;;  %p75_p2 = scmp.lt.s32.totalorder %s69_s8, %s69_s8 }
   0x6   :  { %p76_p3 = por %p75_p2, %p74_p1 }
   0x8   :  { %p77_p4 = pnand %p76_p3, %p70_p0 }
   0xa   :  { %80 = shalt.err (!%p77_p4)
}
   0xb   :  { %17 = dma.hbm_to_vmem [thread:$0]  %s123_s0, 32, %s15_s7, [#allocation3]  }
   0xc   :  { %101 = dma.done.wait [#allocation3], 32  }
   0xd   :  { %102 = vsyncadd [#allocation3], 4294967264  ;;  %vm22_vm0 = vcmask 1040384   ;;  %v21_v0 = vld [vmem:[#allocation2] sm:$0x1]  ;;  %s106_s0 = smov [#allocation5]  }
   0xe   :  { %v23_v1 = vsel %vm22_vm0, %v21_v0, -inf  ;;  %v35_v7 = vld [vmem:[#allocation2 + $0x1] sm:$0x1]  ;;  %s46_s11 = sshll.u32 %s106_s0, 4  ;;  %s47_s11 = int_to_ptr.vmem [resolvable:$true] %s46_s11 }
   0xf   :  { %24 = vmax.xlane.f32.xlu0 %v23_v1  ;;  %v36_v8 = vadd.f32 0.5, %v35_v7  ;;  %s81_s12 = scalar_lea.vmem %s47_s11, 32  ;;  %p86_p6 = scmp.lt.s32.totalorder %s47_s11, %s47_s11 }
  0x10   :  { %p82_p5 = scmp.ne.s32.totalorder %s47_s11, %s81_s12  ;;  %p87_p7 = scmp.lt.s32.totalorder %s81_s12, %s81_s12 }
  0x11   :  { %v37_v9 = vmax.f32 %v36_v8, 0.0 }
  0x12   :  { %p88_p8 = por %p87_p7, %p86_p6 }
  0x13   :  { %v38_v10 = vmin.f32 %v37_v9, 1.0 }
  0x14   :  { %p89_p9 = pnand %p88_p8, %p82_p5 }
  0x15   :  { %39 = vst [vmem:[#allocation5 + $0x1] sm:$0x1] %v38_v10 }
  0x98   :  { %v25_v2 = vpop.xlane.xlu0 %24 }
  0x99   :  { %v26_v3 = vsub.f32 %v21_v0, %v25_v2 }
  0x9b   :  { %v27_v4 = vmul.f32 1.442695, %v26_v3 }
  0x9d   :  { %57 = vpow2.f32 %v27_v4 }
  0xaa   :  { %v58_v5 = vpop.eup %57 }
  0xab   :  { %v29_v6 = vsel %vm22_vm0, %v58_v5, 0.0 }
  0xac   :  { %30 = vadd.xlane.f32.xlu0 %v29_v6 }
 0x135   :  { %v31_v11 = vpop.xlane.xlu0 %30 }
 0x136   :  { %59 = vrcp.f32 %v31_v11 }
 0x143   :  { %v60_v12 = vpop.eup %59 }
 0x144   :  { %v33_v13 = vmul.f32 %v60_v12, %v58_v5 }
 0x146   :  { %34 = vst [vmem:[#allocation5] sm:$0x1] %v33_v13 }
 0x147   :  { %92 = shalt.err (!%p89_p9)
}
 0x148   :  { %49 = dma.vmem_to_hbm [thread:$0]  %s47_s11, 32, %s124_s1, [#allocation4]  }
 0x149   :  { %103 = dma.done.wait [#allocation4], 32  }
 0x14a   :  { %104 = vsyncadd [#allocation4], 4294967264 }
 0x14b   :  { %53 = vsyncpa [#allocation3], 1 }
 0x14c   :  { %54 = vsyncpa [#allocation4], 1 }

</bundles_post_ra>
